<compile_context>
chip_gen: v5e
topology: v5e:2x2
jax: 0.10.0
libtpu: 0.0.40
codegen_flags: <defaults>
</compile_context>

<pallas_src>
import functools
import math

import jax
import jax.numpy as jnp
from jax.experimental import pallas as pl
from jax.experimental.pallas import tpu as pltpu


def _int_pow(x, n: int):
    """x**n for a small non-negative integer n via multiplies (keeps the EUP free)."""
    result = None
    base = x
    while n:
        if n & 1:
            result = base if result is None else result * base
        n >>= 1
        if n:
            base = base * base
    return jnp.ones_like(x) if result is None else result


def _pow(x, g: float):
    if float(g).is_integer() and 0.0 <= g <= 8.0:
        return _int_pow(x, int(g))
    return jnp.power(x, g)


def _poly1_focal_kernel(logits_ref, labels_ref, out_ref, *,
                        epsilon, gamma, alpha, label_smoothing):
    x = logits_ref[...].astype(jnp.float32)
    y = labels_ref[...].astype(jnp.float32)

    if label_smoothing is not None:
        y = y * (1.0 - label_smoothing) + 0.5 * label_smoothing

    # One EUP exp per element: e = exp(-|x|) feeds both the sigmoid and log1p term.
    e = jnp.exp(-jnp.abs(x))
    inv_1pe = pl.reciprocal(1.0 + e)                       # exact 1 / (1 + e)
    p = jnp.where(x >= 0.0, inv_1pe, e * inv_1pe)          # sigmoid(x)

    # Numerically-stable BCE-with-logits: max(x,0) - x*y + log1p(exp(-|x|))
    bce = jnp.maximum(x, 0.0) - x * y + jnp.log1p(e)
    # TODO(synk): the module's optional per-class `weight` tensor (default None) would
    # be a third tiled input multiplied into `bce` here.

    pt = y * p + (1.0 - y) * (1.0 - p)
    one_m_pt = 1.0 - pt

    fl = bce * _pow(one_m_pt + 1e-8, gamma)
    if alpha is not None:
        fl = (alpha * y + (1.0 - alpha) * (1.0 - y)) * fl

    poly1 = fl + epsilon * _pow(one_m_pt, gamma + 1.0)
    out_ref[...] = poly1.astype(out_ref.dtype)


def poly1_focal_loss(logits, labels, *,
                     epsilon: float = 1.0,
                     gamma: float = 2.0,
                     alpha=None,
                     reduction: str = "none",
                     label_smoothing=None,
                     lane: int = 512,
                     block_rows=None):
    """Returns (poly1, gamma) exactly like the PyTorch module's forward."""
    assert logits.shape == labels.shape
    orig_shape = logits.shape
    out_dtype = logits.dtype
    total = math.prod(orig_shape) if orig_shape else 1

    # Pick a lane width (multiple of 128) that divides the element count so the
    # flatten + reshape is a free view (no padding copy in HBM). Fall back to the
    # requested lane with a small pad if nothing divides.
    candidates = [c for c in (int(lane), 512, 256, 128) if c > 0 and c % 128 == 0]
    lane_eff = None
    for c in candidates:
        if total % c == 0:
            lane_eff = c
            break
    if lane_eff is None:
        lane_eff = candidates[0]

    rows = pl.cdiv(total, lane_eff)
    pad = rows * lane_eff - total

    def to2d(a):
        flat = a.reshape(-1)
        if pad:
            flat = jnp.pad(flat, (0, pad))
        return flat.reshape(rows, lane_eff)

    # ~1 MiB f32 blocks: large enough to hit the HBM roofline, small enough that
    # 3 operands x 2 pipeline buffers fit comfortably in default scoped VMEM.
    if block_rows is None:
        cap = max(16, (((512 * 512) // lane_eff) // 16) * 16)
    else:
        cap = max(8, ((int(block_rows) + 7) // 8) * 8)

    if rows <= cap:
        block_rows_eff = rows   # full-extent block (exempt from the 8/128 rule)
    else:
        block_rows_eff = cap    # ragged last block is masked by Pallas

    grid = pl.cdiv(rows, block_rows_eff)

    kernel = functools.partial(
        _poly1_focal_kernel,
        epsilon=float(epsilon),
        gamma=float(gamma),
        alpha=None if alpha is None else float(alpha),
        label_smoothing=None if label_smoothing is None else float(label_smoothing),
    )

    out2 = pl.pallas_call(
        kernel,
        out_shape=jax.ShapeDtypeStruct((rows, lane_eff), out_dtype),
        grid_spec=pltpu.PrefetchScalarGridSpec(
            num_scalar_prefetch=0,
            grid=(grid,),
            in_specs=[
                pl.BlockSpec((block_rows_eff, lane_eff), lambda i: (i, 0)),
                pl.BlockSpec((block_rows_eff, lane_eff), lambda i: (i, 0)),
            ],
            out_specs=pl.BlockSpec((block_rows_eff, lane_eff), lambda i: (i, 0)),
        ),
        compiler_params=pltpu.CompilerParams(
            dimension_semantics=("parallel",)),
    )(to2d(logits), to2d(labels))

    if pad:
        poly1 = out2.reshape(-1)[:total].reshape(orig_shape)
    else:
        poly1 = out2.reshape(orig_shape)

    # Reduction glue (module default is 'none').
    # TODO(synk): for 'mean'/'sum' a fused in-kernel masked accumulator would save the
    # output write-back; kept outside since the module default is 'none'.
    if reduction == "mean":
        poly1 = jnp.mean(poly1)
    elif reduction == "sum":
        poly1 = jnp.sum(poly1)

    return poly1, gamma


def _reference(logits, labels, *, epsilon=1.0, gamma=2.0, alpha=None,
               reduction="none", label_smoothing=None):
    x = logits.astype(jnp.float32)
    y = labels.astype(jnp.float32)
    if label_smoothing is not None:
        y = y * (1 - label_smoothing) + 0.5 * label_smoothing
    p = jax.nn.sigmoid(x)
    bce = jnp.maximum(x, 0.0) - x * y + jnp.log1p(jnp.exp(-jnp.abs(x)))
    pt = y * p + (1 - y) * (1 - p)
    fl = bce * (1 - pt + 1e-8) ** gamma
    if alpha is not None:
        fl = (alpha * y + (1 - alpha) * (1 - y)) * fl
    poly1 = fl + epsilon * (1 - pt) ** (gamma + 1)
    if reduction == "mean":
        poly1 = jnp.mean(poly1)
    elif reduction == "sum":
        poly1 = jnp.sum(poly1)
    return poly1


if __name__ == "__main__":
    key = jax.random.PRNGKey(0)
    k1, k2, k3, k4, k5, k6 = jax.random.split(key, 6)

    # 1) Point-cloud style shape: 256 points, 4 classes, module defaults.
    #    total % 512 == 0  ->  no padding, single full-extent block.
    logits = jax.random.normal(k1, (256, 4), dtype=jnp.float32) * 2.0
    labels = (jax.random.uniform(k2, (256, 4)) > 0.5).astype(jnp.float32)
    poly1, gamma = poly1_focal_loss(logits, labels)
    poly1 = jax.block_until_ready(poly1)
    assert poly1.shape == logits.shape
    assert gamma == 2.0
    assert jnp.allclose(poly1, _reference(logits, labels), atol=1e-5, rtol=1e-5), \
        "mismatch vs reference (default config)"

    # 2) Ragged total (pad fallback) + alpha + non-integer gamma + smoothing + mean.
    logits_b = jax.random.normal(k3, (123, 5), dtype=jnp.float32) * 3.0
    labels_b = (jax.random.uniform(k4, (123, 5)) > 0.5).astype(jnp.float32)
    out_b, g_b = poly1_focal_loss(logits_b, labels_b, gamma=1.5, alpha=0.25,
                                  reduction="mean", label_smoothing=0.1)
    out_b = jax.block_until_ready(out_b)
    ref_b = _reference(logits_b, labels_b, gamma=1.5, alpha=0.25,
                       reduction="mean", label_smoothing=0.1)
    assert g_b == 1.5
    assert jnp.allclose(out_b, ref_b, atol=1e-5, rtol=1e-5), \
        "mismatch vs reference (pad path / alpha / smoothing / mean)"

    # 3) Multi-step grid with a ragged (Pallas-masked) last row-block, no padding:
    #    total = 416*4 = 1664 = 13*128 -> lane 128, 13 rows over 8-row blocks.
    logits_c = jax.random.normal(k5, (416, 4), dtype=jnp.float32) * 2.5
    labels_c = (jax.random.uniform(k6, (416, 4)) > 0.5).astype(jnp.float32)
    out_c, _ = poly1_focal_loss(logits_c, labels_c, lane=128, block_rows=8)
    out_c = jax.block_until_ready(out_c)
    assert jnp.allclose(out_c, _reference(logits_c, labels_c), atol=1e-5, rtol=1e-5), \
        "mismatch vs reference (ragged multi-block grid)"

    print("KERNEL_OK")
</pallas_src>

<mosaic_0001>
module attributes {stable_mosaic.version = 11 : i64} {
  func.func @_poly1_focal_kernel(%arg0: i32, %arg1: memref<2x512xf32, #tpu.memory_space<vmem>>, %arg2: memref<2x512xf32, #tpu.memory_space<vmem>>, %arg3: memref<2x512xf32, #tpu.memory_space<vmem>>) attributes {dimension_semantics = [#tpu.dimension_semantics<parallel>], iteration_bounds = array<i64: 1>, scalar_prefetch = 0 : i64, scratch_operands = 0 : i64, tpu.core_type = #tpu.core_type<tc>, window_params = [{transform_indices = @transform_0, window_bounds = array<i64: 2, 512>}, {transform_indices = @transform_1, window_bounds = array<i64: 2, 512>}, {transform_indices = @transform_2, window_bounds = array<i64: 2, 512>}]} {
    %c0 = arith.constant 0 : index
    %c0_0 = arith.constant 0 : index
    %0 = vector.load %arg1[%c0, %c0_0] : memref<2x512xf32, #tpu.memory_space<vmem>>, vector<2x512xf32>
    %c0_1 = arith.constant 0 : index
    %c0_2 = arith.constant 0 : index
    %1 = vector.load %arg2[%c0_1, %c0_2] : memref<2x512xf32, #tpu.memory_space<vmem>>, vector<2x512xf32>
    %2 = math.absf %0 : vector<2x512xf32>
    %cst = arith.constant 0.000000e+00 : f32
    %3 = vector.broadcast %cst : f32 to vector<2x512xf32>
    %4 = arith.subf %3, %2 : vector<2x512xf32>
    %5 = math.exp %4 : vector<2x512xf32>
    %cst_3 = arith.constant 1.000000e+00 : f32
    %6 = vector.broadcast %cst_3 : f32 to vector<2x512xf32>
    %7 = arith.addf %6, %5 : vector<2x512xf32>
    %8 = tpu.reciprocal %7 : vector<2x512xf32> -> vector<2x512xf32>
    %cst_4 = arith.constant 0.000000e+00 : f32
    %9 = vector.broadcast %cst_4 : f32 to vector<2x512xf32>
    %10 = arith.cmpf oge, %0, %9 : vector<2x512xf32>
    %11 = arith.mulf %5, %8 : vector<2x512xf32>
    %12 = arith.select %10, %8, %11 : vector<2x512xi1>, vector<2x512xf32>
    %cst_5 = arith.constant 0.000000e+00 : f32
    %13 = vector.broadcast %cst_5 : f32 to vector<2x512xf32>
    %14 = arith.maximumf %0, %13 : vector<2x512xf32>
    %15 = arith.mulf %0, %1 : vector<2x512xf32>
    %16 = arith.subf %14, %15 : vector<2x512xf32>
    %17 = math.log1p %5 : vector<2x512xf32>
    %18 = arith.addf %16, %17 : vector<2x512xf32>
    %19 = arith.mulf %1, %12 : vector<2x512xf32>
    %cst_6 = arith.constant 1.000000e+00 : f32
    %20 = vector.broadcast %cst_6 : f32 to vector<2x512xf32>
    %21 = arith.subf %20, %1 : vector<2x512xf32>
    %cst_7 = arith.constant 1.000000e+00 : f32
    %22 = vector.broadcast %cst_7 : f32 to vector<2x512xf32>
    %23 = arith.subf %22, %12 : vector<2x512xf32>
    %24 = arith.mulf %21, %23 : vector<2x512xf32>
    %25 = arith.addf %19, %24 : vector<2x512xf32>
    %cst_8 = arith.constant 1.000000e+00 : f32
    %26 = vector.broadcast %cst_8 : f32 to vector<2x512xf32>
    %27 = arith.subf %26, %25 : vector<2x512xf32>
    %cst_9 = arith.constant 9.99999993E-9 : f32
    %28 = vector.broadcast %cst_9 : f32 to vector<2x512xf32>
    %29 = arith.addf %27, %28 : vector<2x512xf32>
    %30 = arith.mulf %29, %29 : vector<2x512xf32>
    %31 = arith.mulf %18, %30 : vector<2x512xf32>
    %32 = arith.mulf %27, %27 : vector<2x512xf32>
    %33 = arith.mulf %27, %32 : vector<2x512xf32>
    %cst_10 = arith.constant 1.000000e+00 : f32
    %34 = vector.broadcast %cst_10 : f32 to vector<2x512xf32>
    %35 = arith.mulf %34, %33 : vector<2x512xf32>
    %36 = arith.addf %31, %35 : vector<2x512xf32>
    %c0_11 = arith.constant 0 : index
    %c0_12 = arith.constant 0 : index
    %37 = vector.load %arg3[%c0_11, %c0_12] : memref<2x512xf32, #tpu.memory_space<vmem>>, vector<2x512xf32>
    tpu.vector_store %arg3[%c0_11, %c0_12], %36 {strides = array<i32>} : memref<2x512xf32, #tpu.memory_space<vmem>>, vector<2x512xf32>,
    return
  }
  func.func @transform_0(%arg0: i32) -> (i32, i32) {
    %c0_i32 = arith.constant 0 : i32
    %c0_i32_0 = arith.constant 0 : i32
    return %arg0, %c0_i32 : i32, i32
  }
  func.func @transform_1(%arg0: i32) -> (i32, i32) {
    %c0_i32 = arith.constant 0 : i32
    %c0_i32_0 = arith.constant 0 : i32
    return %arg0, %c0_i32 : i32, i32
  }
  func.func @transform_2(%arg0: i32) -> (i32, i32) {
    %c0_i32 = arith.constant 0 : i32
    %c0_i32_0 = arith.constant 0 : i32
    return %arg0, %c0_i32 : i32, i32
  }
}

</mosaic_0001>

<bundles_post_ra>
// kernel: tpu_custom_call.1
= control target key start
LH: loop header
LB: loop body
LE: loop exit
PB: predicated region body
PF: predicated region fallthrough
CT: control target
= control target key end

     0   :  { %7 = vsyncpa [#allocation3], 0  ;;  %s222_s0 = inlined_call_operand.hbm [shape: f32[2,512], index: 0, kind: input, shape index: {}]   ;;  %s223_s1 = inlined_call_operand.hbm [shape: f32[2,512], index: 1, kind: input, shape index: {}]   ;;  %s224_s2 = inlined_call_operand.hbm [shape: f32[2,512], index: 2, kind: output, shape index: {}]  }
   0x1   :  { %8 = vsyncpa [#allocation6], 0 }
   0x2   :  { %9 = vsyncpa [#allocation4], 0  ;;  %s15_s11 = sshll.u32 %s222_s0, 4  ;;  %s195_s12 = smov [#allocation2]   ;;  %s16_s11 = int_to_ptr.hbm [resolvable:$true] %s15_s11 }
   0x3   :  { %s17_s13 = sshll.u32 %s195_s12, 4  ;;  %s26_s16 = sshll.u32 %s223_s1, 4  ;;  %s18_s13 = int_to_ptr.vmem [resolvable:$true] %s17_s13  ;;  %s27_s16 = int_to_ptr.hbm [resolvable:$true] %s26_s16 }
   0x4   :  { %20 = dma.hbm_to_vmem [thread:$0]  %s16_s11, 128, %s18_s13, [#allocation3]  }
   0x5   :  { %s196_s17 = smov [#allocation5]  }
   0x6   :  { %s28_s18 = sshll.u32 %s196_s17, 4  ;;  %s29_s18 = int_to_ptr.vmem [resolvable:$true] %s28_s18 }
   0x7   :  { %31 = dma.hbm_to_vmem [thread:$0]  %s27_s16, 128, %s29_s18, [#allocation6]  }
   0x8   :  { %189 = dma.done.wait [#allocation3], 128  }
   0x9   :  { %190 = vsyncadd [#allocation3], 4294967168 }
   0xa   :  { %191 = dma.done.wait [#allocation6], 128  }
   0xb   :  { %192 = vsyncadd [#allocation6], 4294967168  ;;  %v40_v0 = vld [vmem:[#allocation2] sm:$0xff]  ;;  %v41_v15 = vld [vmem:[#allocation5] sm:$0xff]  ;;  %s197_s0 = smov [#allocation7]   ;;  %s97_s21 = sshll.u32 %s224_s2, 4  ;;  %s98_s21 = int_to_ptr.hbm [resolvable:$true] %s97_s21 }
   0xc   :  { %v42_v1 = vand.u32 2147483647, %v40_v0  ;;  %vm61_vm4 = vcmp.ge.f32.partialorder %v40_v0, 0.0  ;;  %v78_v22 = vsub.f32 1.0, %v41_v15  ;;  %v64_v24 = vmax.f32 %v40_v0, 0.0  ;;  %s95_s1 = sshll.u32 %s197_s0, 4  ;;  %s96_s1 = int_to_ptr.vmem [resolvable:$true] %s95_s1 }
   0xd   :  { %v65_v25 = vmul.f32 %v41_v15, %v40_v0 }
   0xe   :  { %v43_v2 = vsub.f32 0.0, %v42_v1 }
   0xf   :  { %v66_v31 = vsub.f32 %v64_v24, %v65_v25 }
  0x10   :  { %v44_v3 = vmul.f32 1.442695, %v43_v2 }
  0x12   :  { %111 = vpow2.f32 %v44_v3 }
  0x18   :  { %v112_v4 = vpop.eup %111 }
  0x19   :  { %v46_v5 = vadd.f32 1.0, %v112_v4  ;;  %v70_v14 = vmul.f32 -0.5, %v112_v4  ;;  %v73_v21 = vand.u32 2147483647, %v112_v4 }
  0x1b   :  { %113 = vrcp.f32 %v46_v5  ;;  %v58_v8 = vand.u32 2147483648, %v46_v5  ;;  %vm52_vm0 = vweird.f32 %v46_v5  ;;  %v56_v10 = vand.u32 2147483647, %v46_v5 }
  0x1c   :  { %115 = vlog2.f32 %v46_v5  ;;  %v71_v19 = vadd.f32 1.0, %v70_v14  ;;  %vm74_vm5 = vcmp.lt.f32.partialorder %v73_v21, 0.0004427343 }
  0x1d   :  { %v59_v12 = vor.u32 1.1754944e-38, %v58_v8  ;;  %vm57_vm3 = vcmp.eq.f32.partialorder %v56_v10, 8.507059e+37 }
  0x1e   :  { %v72_v29 = vmul.f32 %v112_v4, %v71_v19 }
  0x21   :  { %v114_v6 = vpop.eup %113 }
  0x22   :  { %v48_v7 = vmul.f32 %v114_v6, %v46_v5  ;;  %vm53_vm1 = vweird.f32 %v114_v6  ;;  %v116_v20 = vpop.eup %115 }
  0x23   :  { %vm54_vm2 = vmor %vm52_vm0, %vm53_vm1  ;;  %v69_v28 = vmul.f32 0.6931472, %v116_v20 }
  0x24   :  { %v49_v9 = vsub.f32 1.0, %v48_v7 }
  0x25   :  { %v75_v33 = vsel %vm74_vm5, %v72_v29, %v69_v28 }
  0x26   :  { %v50_v11 = vmul.f32 %v114_v6, %v49_v9  ;;  %v76_v35 = vadd.f32 %v75_v33, %v66_v31 }
  0x28   :  { %v51_v13 = vadd.f32 %v114_v6, %v50_v11 }
  0x2a   :  { %v55_v16 = vsel %vm54_vm2, %v114_v6, %v51_v13 }
  0x2b   :  { %v60_v17 = vsel %vm57_vm3, %v59_v12, %v55_v16 }
  0x2c   :  { %v62_v18 = vmul.f32 %v112_v4, %v60_v17 }
  0x2e   :  { %v63_v23 = vsel %vm61_vm4, %v60_v17, %v62_v18 }
  0x2f   :  { %v77_v26 = vmul.f32 %v63_v23, %v41_v15  ;;  %v79_v27 = vsub.f32 1.0, %v63_v23 }
  0x31   :  { %v80_v30 = vmul.f32 %v79_v27, %v78_v22 }
  0x33   :  { %v81_v32 = vadd.f32 %v80_v30, %v77_v26 }
  0x35   :  { %v82_v34 = vsub.f32 1.0, %v81_v32 }
  0x37   :  { %v83_v36 = vadd.f32 1e-08, %v82_v34  ;;  %v86_v37 = vmul.f32 %v82_v34, %v82_v34 }
  0x39   :  { %v84_v38 = vmul.f32 %v83_v36, %v83_v36  ;;  %v87_v39 = vmul.f32 %v86_v37, %v82_v34 }
  0x3b   :  { %v85_v40 = vmul.f32 %v84_v38, %v76_v35 }
  0x3d   :  { %v88_v41 = vadd.f32 %v87_v39, %v85_v40 }
  0x3f   :  { %89 = vst [vmem:[#allocation7] sm:$0xff] %v88_v41 }
  0x40   :  { %100 = dma.vmem_to_hbm [thread:$0]  %s96_s1, 128, %s98_s21, [#allocation4]  }
  0x41   :  { %193 = dma.done.wait [#allocation4], 128  }
  0x42   :  { %194 = vsyncadd [#allocation4], 4294967168 }
  0x43   :  { %105 = vsyncpa [#allocation3], 1 }
  0x44   :  { %106 = vsyncpa [#allocation6], 1 }
  0x45   :  { %107 = vsyncpa [#allocation4], 1 }

</bundles_post_ra>
